<compile_context>
chip_gen: v5e
topology: v5e:2x2
jax: 0.10.0
libtpu: 0.0.40
codegen_flags: <defaults>
</compile_context>

<pallas_src>
import functools

import jax
import jax.numpy as jnp
from jax import lax
from jax.experimental import pallas as pl
from jax.experimental.pallas import tpu as pltpu


# ----------------------------- problem sizes ------------------------------
B = 2            # batch
N = 8            # sequence length
F = 32           # features
H = 4            # num_heads
DH = 8           # head_features
M = H * DH       # mid_features = 32
O = F            # out_features (default = features)
EPS = 1e-5
SCALE = DH ** (-0.5)
CAUSAL = False   # module default


# ------------------------------- the kernel --------------------------------
def _attention_kernel(x_ref, wqkv_ref, wo_ref, bias_ref, o_ref, *, causal):
    # Single grid step: whole batch resident.  (B, N, F) -> (B*N, F) is a
    # leading-dim (sublane) merge: layout free.
    x = x_ref[...].reshape(B * N, F)                     # (16, 32) f32

    # --- shared LayerNorm statistics (affines are folded into the weights;
    #     norm and norm_context both normalize the same x in self-attention) ---
    mu = jnp.mean(x, axis=-1, keepdims=True)
    xc = x - mu
    var = jnp.mean(xc * xc, axis=-1, keepdims=True)
    nhat = xc * lax.rsqrt(var + EPS)                     # (B*N, F)

    # --- fused q/k/v projection (one MXU push; LN affines + scale pre-folded) ---
    qkv = (jnp.dot(nhat, wqkv_ref[...], preferred_element_type=jnp.float32)
           + bias_ref[0])                                # (B*N, 3M) = (16, 96)

    # Output accumulator starts at the output-projection bias.
    acc = jnp.broadcast_to(bias_ref[1, :O], (B * N, O)).astype(jnp.float32)

    if causal:
        row = lax.broadcasted_iota(jnp.int32, (N, N), 0)
        col = lax.broadcasted_iota(jnp.int32, (N, N), 1)
        causal_keep = col <= row                         # (N, N) bool
        neg = jnp.float32(-1e30)                         # finite sentinel

    # Multi-head attention; heads are contiguous lane slices of qkv
    # (same split order as 'b n (h d) -> b h n d').  Each head is batched over
    # the batch dim, and its contribution to the output projection is
    # accumulated directly (no mid buffer, no concatenate).
    for h in range(H):
        lo = h * DH
        qh = qkv[:, lo:lo + DH].reshape(B, N, DH)               # (B, N, DH)
        kh = qkv[:, M + lo:M + lo + DH].reshape(B, N, DH)       # (B, N, DH)
        vh = qkv[:, 2 * M + lo:2 * M + lo + DH].reshape(B, N, DH)

        # scale already folded into Wq'
        sim = jnp.einsum('bnd,bmd->bnm', qh, kh,
                         preferred_element_type=jnp.float32)    # (B, N, N)
        if causal:
            sim = jnp.where(causal_keep, sim, neg)
        sim = sim - jnp.max(sim, axis=-1, keepdims=True)
        p = jnp.exp(sim)
        attn = p * pl.reciprocal(jnp.sum(p, axis=-1, keepdims=True), approx=True)

        oh = jnp.einsum('bnm,bmd->bnd', attn, vh,
                        preferred_element_type=jnp.float32)     # (B, N, DH)

        # Fused output projection: accumulate this head's slice of Wo.
        acc = acc + jnp.dot(oh.reshape(B * N, DH), wo_ref[lo:lo + DH, :],
                            preferred_element_type=jnp.float32)

    o_ref[...] = acc.reshape(B, N, O)


# --------------------- one-time parameter preparation -----------------------
def prepare_params(params):
    """Fold LN affines + softmax scale into the projection weights (exact)."""
    g1, b1, g2, b2, wq, wkv, wo, bo = params
    wq_f = (g1[:, None] * wq) * SCALE                     # (F, M)
    bq = (b1 @ wq) * SCALE                                # (M,)
    wkv_f = g2[:, None] * wkv                             # (F, 2M)
    bkv = b2 @ wkv                                        # (2M,)
    wqkv = jnp.concatenate([wq_f, wkv_f], axis=1)         # (F, 3M)

    assert O <= 3 * M
    bias = jnp.zeros((2, 3 * M), jnp.float32)
    bias = bias.at[0].set(jnp.concatenate([bq, bkv]))     # row 0: qkv bias
    bias = bias.at[1, :O].set(bo)                         # row 1: out bias
    return wqkv, wo, bias


# ------------------------------- wrapper ------------------------------------
def attention_pallas(x, wqkv, wo, bias, *, causal=False):
    kernel = functools.partial(_attention_kernel, causal=causal)
    return pl.pallas_call(
        kernel,
        out_shape=jax.ShapeDtypeStruct((B, N, O), jnp.float32),
        grid_spec=pltpu.PrefetchScalarGridSpec(
            num_scalar_prefetch=0,
            grid=(1,),                                           # single step
            in_specs=[
                pl.BlockSpec((B, N, F), lambda i: (0, 0, 0)),    # x (whole batch)
                pl.BlockSpec((F, 3 * M), lambda i: (0, 0)),      # Wqkv (folded)
                pl.BlockSpec((M, O), lambda i: (0, 0)),          # Wo
                pl.BlockSpec((2, 3 * M), lambda i: (0, 0)),      # [bqkv ; bo(pad)]
            ],
            out_specs=pl.BlockSpec((B, N, O), lambda i: (0, 0, 0)),
        ),
    )(x, wqkv, wo, bias)


# --------------------------- pure-JAX reference ------------------------------
def attention_reference(x, params, *, causal=False):
    g1, b1, g2, b2, wq, wkv, wo, bo = params

    def ln(z, g, b):
        mu = jnp.mean(z, axis=-1, keepdims=True)
        var = jnp.mean((z - mu) ** 2, axis=-1, keepdims=True)
        return (z - mu) / jnp.sqrt(var + EPS) * g + b

    xn = ln(x, g1, b1)
    cn = ln(x, g2, b2)
    q = xn @ wq
    k = cn @ wkv[:, :M]
    v = cn @ wkv[:, M:]
    qh = q.reshape(B, N, H, DH).transpose(0, 2, 1, 3)
    kh = k.reshape(B, N, H, DH).transpose(0, 2, 1, 3)
    vh = v.reshape(B, N, H, DH).transpose(0, 2, 1, 3)
    sim = jnp.einsum("bhnd,bhmd->bhnm", qh, kh) * SCALE
    if causal:
        keep = jnp.tril(jnp.ones((N, N), dtype=bool))
        sim = jnp.where(keep, sim, -jnp.finfo(jnp.float32).max)
    attn = jax.nn.softmax(sim.astype(jnp.float32), axis=-1)
    out = jnp.einsum("bhnm,bhmd->bhnd", attn, vh)
    out = out.transpose(0, 2, 1, 3).reshape(B, N, M)
    return out @ wo + bo


# --------------------------------- main --------------------------------------
if __name__ == "__main__":
    key = jax.random.PRNGKey(0)
    kx, kg1, kb1, kg2, kb2, kq, kkv, kwo, kbo = jax.random.split(key, 9)

    x = jax.random.normal(kx, (B, N, F), dtype=jnp.float32)

    # Deterministic parameter init (shapes follow the nn.Module __init__).
    g1 = 1.0 + 0.05 * jax.random.normal(kg1, (F,), dtype=jnp.float32)      # norm.weight
    b1 = 0.05 * jax.random.normal(kb1, (F,), dtype=jnp.float32)            # norm.bias
    g2 = 1.0 + 0.05 * jax.random.normal(kg2, (F,), dtype=jnp.float32)      # norm_context.weight
    b2 = 0.05 * jax.random.normal(kb2, (F,), dtype=jnp.float32)            # norm_context.bias
    wq = 0.1 * jax.random.normal(kq, (F, M), dtype=jnp.float32)            # to_q.weight.T
    wkv = 0.1 * jax.random.normal(kkv, (F, 2 * M), dtype=jnp.float32)      # to_kv.weight.T (fused)
    wo = 0.1 * jax.random.normal(kwo, (M, O), dtype=jnp.float32)           # to_out.weight.T
    bo = 0.05 * jax.random.normal(kbo, (O,), dtype=jnp.float32)            # to_out.bias

    params = (g1, b1, g2, b2, wq, wkv, wo, bo)

    # One-time weight folding / packing (kept out of the per-call path).
    wqkv_f, wo_f, bias_f = prepare_params(params)
    wqkv_f, wo_f, bias_f = jax.block_until_ready((wqkv_f, wo_f, bias_f))

    out = attention_pallas(x, wqkv_f, wo_f, bias_f, causal=CAUSAL)
    out = jax.block_until_ready(out)

    ref = attention_reference(x, params, causal=CAUSAL)
    assert out.shape == (B, N, O)
    # Tolerance covers the approximate EUP reciprocal in the softmax denominator
    # and fp reassociation from folding the LN affines / scale into the weights.
    err = float(jnp.max(jnp.abs(out - ref)))
    assert err < 1e-3, f"max abs err {err}"

    # TODO(synk): optional `context` / `context_mask` inputs (cross-attention path)
    # are not wired through the kernel; self-attention (context=x) is implemented.
    print("KERNEL_OK")
</pallas_src>

<mosaic_0001>
module attributes {stable_mosaic.version = 11 : i64} {
  func.func @_attention_kernel(%arg0: i32, %arg1: memref<2x8x32xf32, #tpu.memory_space<vmem>>, %arg2: memref<32x96xf32, #tpu.memory_space<vmem>>, %arg3: memref<32x32xf32, #tpu.memory_space<vmem>>, %arg4: memref<2x96xf32, #tpu.memory_space<vmem>>, %arg5: memref<2x8x32xf32, #tpu.memory_space<vmem>>) attributes {dimension_semantics = [#tpu.dimension_semantics<arbitrary>], iteration_bounds = array<i64: 1>, scalar_prefetch = 0 : i64, scratch_operands = 0 : i64, tpu.core_type = #tpu.core_type<tc>, window_params = [{pipeline_mode = #tpu.pipeline_mode<synchronous>, transform_indices = @transform_0, window_bounds = array<i64: 2, 8, 32>}, {pipeline_mode = #tpu.pipeline_mode<synchronous>, transform_indices = @transform_1, window_bounds = array<i64: 32, 96>}, {pipeline_mode = #tpu.pipeline_mode<synchronous>, transform_indices = @transform_2, window_bounds = array<i64: 32, 32>}, {pipeline_mode = #tpu.pipeline_mode<synchronous>, transform_indices = @transform_3, window_bounds = array<i64: 2, 96>}, {pipeline_mode = #tpu.pipeline_mode<synchronous>, transform_indices = @transform_4, window_bounds = array<i64: 2, 8, 32>}]} {
    %c0 = arith.constant 0 : index
    %c0_0 = arith.constant 0 : index
    %c0_1 = arith.constant 0 : index
    %0 = vector.load %arg1[%c0, %c0_0, %c0_1] : memref<2x8x32xf32, #tpu.memory_space<vmem>>, vector<2x8x32xf32>
    %1 = vector.shape_cast %0 : vector<2x8x32xf32> to vector<16x32xf32>
    %cst = arith.constant dense<0.000000e+00> : vector<16xf32>
    %2 = vector.multi_reduction <add>, %1, %cst [1] : vector<16x32xf32> to vector<16xf32>
    %3 = vector.shape_cast %2 : vector<16xf32> to vector<16x1xf32>
    %cst_2 = arith.constant 3.200000e+01 : f32
    %4 = vector.broadcast %cst_2 : f32 to vector<16x1xf32>
    %5 = arith.divf %3, %4 : vector<16x1xf32>
    %6 = vector.broadcast %5 : vector<16x1xf32> to vector<16x32xf32>
    %7 = arith.subf %1, %6 : vector<16x32xf32>
    %8 = arith.mulf %7, %7 : vector<16x32xf32>
    %cst_3 = arith.constant dense<0.000000e+00> : vector<16xf32>
    %9 = vector.multi_reduction <add>, %8, %cst_3 [1] : vector<16x32xf32> to vector<16xf32>
    %10 = vector.shape_cast %9 : vector<16xf32> to vector<16x1xf32>
    %cst_4 = arith.constant 3.200000e+01 : f32
    %11 = vector.broadcast %cst_4 : f32 to vector<16x1xf32>
    %12 = arith.divf %10, %11 : vector<16x1xf32>
    %cst_5 = arith.constant 9.99999974E-6 : f32
    %13 = vector.broadcast %cst_5 : f32 to vector<16x1xf32>
    %14 = arith.addf %12, %13 : vector<16x1xf32>
    %15 = math.rsqrt %14 : vector<16x1xf32>
    %16 = vector.broadcast %15 : vector<16x1xf32> to vector<16x32xf32>
    %17 = arith.mulf %7, %16 : vector<16x32xf32>
    %c0_6 = arith.constant 0 : index
    %c0_7 = arith.constant 0 : index
    %18 = vector.load %arg2[%c0_6, %c0_7] : memref<32x96xf32, #tpu.memory_space<vmem>>, vector<32x96xf32>
    %cst_8 = arith.constant dense<0.000000e+00> : vector<16x96xf32>
    %19 = tpu.matmul %17, %18, %cst_8 {dimension_numbers = #tpu.dot_dimension_numbers<[1], [0], [0], [1], [0, 0, 1, 1], [], []>} : vector<16x32xf32>, vector<32x96xf32>, vector<16x96xf32> -> vector<16x96xf32>
    %c0_9 = arith.constant 0 : index
    %c0_10 = arith.constant 0 : index
    %20 = vector.load %arg4[%c0_9, %c0_10] : memref<2x96xf32, #tpu.memory_space<vmem>>, vector<1x96xf32>
    %21 = vector.shape_cast %20 : vector<1x96xf32> to vector<96xf32>
    %22 = vector.shape_cast %21 : vector<96xf32> to vector<1x96xf32>
    %23 = vector.broadcast %22 : vector<1x96xf32> to vector<16x96xf32>
    %24 = arith.addf %19, %23 : vector<16x96xf32>
    %c1 = arith.constant 1 : index
    %c0_11 = arith.constant 0 : index
    %25 = vector.load %arg4[%c1, %c0_11] : memref<2x96xf32, #tpu.memory_space<vmem>>, vector<1x32xf32>
    %26 = vector.shape_cast %25 : vector<1x32xf32> to vector<32xf32>
    %27 = vector.shape_cast %26 : vector<32xf32> to vector<1x32xf32>
    %28 = vector.broadcast %27 : vector<1x32xf32> to vector<16x32xf32>
    %29 = vector.extract_strided_slice %24 {offsets = [0, 0], sizes = [16, 8], strides = [1, 1]} : vector<16x96xf32> to vector<16x8xf32>
    %30 = vector.shape_cast %29 : vector<16x8xf32> to vector<2x8x8xf32>
    %31 = vector.extract_strided_slice %24 {offsets = [0, 32], sizes = [16, 8], strides = [1, 1]} : vector<16x96xf32> to vector<16x8xf32>
    %32 = vector.shape_cast %31 : vector<16x8xf32> to vector<2x8x8xf32>
    %33 = vector.extract_strided_slice %24 {offsets = [0, 64], sizes = [16, 8], strides = [1, 1]} : vector<16x96xf32> to vector<16x8xf32>
    %34 = vector.shape_cast %33 : vector<16x8xf32> to vector<2x8x8xf32>
    "tpu.trace_start"() <{level = 10 : i32, message = "bnd,bmd->bnm"}> : () -> ()
    %cst_12 = arith.constant dense<0.000000e+00> : vector<2x8x8xf32>
    %35 = tpu.matmul %30, %32, %cst_12 {dimension_numbers = #tpu.dot_dimension_numbers<[2], [2], [1], [1], [0, 0, 0, 1, 1, 1], [0], [0]>} : vector<2x8x8xf32>, vector<2x8x8xf32>, vector<2x8x8xf32> -> vector<2x8x8xf32>
    "tpu.trace_stop"() : () -> ()
    %cst_13 = arith.constant dense<0xFF800000> : vector<2x8xf32>
    %36 = vector.multi_reduction <maximumf>, %35, %cst_13 [2] : vector<2x8x8xf32> to vector<2x8xf32>
    %37 = vector.shape_cast %36 : vector<2x8xf32> to vector<2x8x1xf32>
    %38 = vector.broadcast %37 : vector<2x8x1xf32> to vector<2x8x8xf32>
    %39 = arith.subf %35, %38 : vector<2x8x8xf32>
    %40 = math.exp %39 : vector<2x8x8xf32>
    %cst_14 = arith.constant dense<0.000000e+00> : vector<2x8xf32>
    %41 = vector.multi_reduction <add>, %40, %cst_14 [2] : vector<2x8x8xf32> to vector<2x8xf32>
    %42 = vector.shape_cast %41 : vector<2x8xf32> to vector<2x8x1xf32>
    %43 = tpu.reciprocal %42 {approx = true} : vector<2x8x1xf32> -> vector<2x8x1xf32>
    %44 = vector.broadcast %43 : vector<2x8x1xf32> to vector<2x8x8xf32>
    %45 = arith.mulf %40, %44 : vector<2x8x8xf32>
    "tpu.trace_start"() <{level = 10 : i32, message = "bnm,bmd->bnd"}> : () -> ()
    %cst_15 = arith.constant dense<0.000000e+00> : vector<2x8x8xf32>
    %46 = tpu.matmul %45, %34, %cst_15 {dimension_numbers = #tpu.dot_dimension_numbers<[2], [1], [1], [2], [0, 0, 0, 1, 1, 2], [0], [0]>} : vector<2x8x8xf32>, vector<2x8x8xf32>, vector<2x8x8xf32> -> vector<2x8x8xf32>
    "tpu.trace_stop"() : () -> ()
    %47 = vector.shape_cast %46 : vector<2x8x8xf32> to vector<16x8xf32>
    %c0_16 = arith.constant 0 : index
    %c0_17 = arith.constant 0 : index
    %48 = vector.load %arg3[%c0_16, %c0_17] : memref<32x32xf32, #tpu.memory_space<vmem>>, vector<8x32xf32>
    %cst_18 = arith.constant dense<0.000000e+00> : vector<16x32xf32>
    %49 = tpu.matmul %47, %48, %cst_18 {dimension_numbers = #tpu.dot_dimension_numbers<[1], [0], [0], [1], [0, 0, 1, 1], [], []>} : vector<16x8xf32>, vector<8x32xf32>, vector<16x32xf32> -> vector<16x32xf32>
    %50 = arith.addf %28, %49 : vector<16x32xf32>
    %51 = vector.extract_strided_slice %24 {offsets = [0, 8], sizes = [16, 8], strides = [1, 1]} : vector<16x96xf32> to vector<16x8xf32>
    %52 = vector.shape_cast %51 : vector<16x8xf32> to vector<2x8x8xf32>
    %53 = vector.extract_strided_slice %24 {offsets = [0, 40], sizes = [16, 8], strides = [1, 1]} : vector<16x96xf32> to vector<16x8xf32>
    %54 = vector.shape_cast %53 : vector<16x8xf32> to vector<2x8x8xf32>
    %55 = vector.extract_strided_slice %24 {offsets = [0, 72], sizes = [16, 8], strides = [1, 1]} : vector<16x96xf32> to vector<16x8xf32>
    %56 = vector.shape_cast %55 : vector<16x8xf32> to vector<2x8x8xf32>
    "tpu.trace_start"() <{level = 10 : i32, message = "bnd,bmd->bnm"}> : () -> ()
    %cst_19 = arith.constant dense<0.000000e+00> : vector<2x8x8xf32>
    %57 = tpu.matmul %52, %54, %cst_19 {dimension_numbers = #tpu.dot_dimension_numbers<[2], [2], [1], [1], [0, 0, 0, 1, 1, 1], [0], [0]>} : vector<2x8x8xf32>, vector<2x8x8xf32>, vector<2x8x8xf32> -> vector<2x8x8xf32>
    "tpu.trace_stop"() : () -> ()
    %cst_20 = arith.constant dense<0xFF800000> : vector<2x8xf32>
    %58 = vector.multi_reduction <maximumf>, %57, %cst_20 [2] : vector<2x8x8xf32> to vector<2x8xf32>
    %59 = vector.shape_cast %58 : vector<2x8xf32> to vector<2x8x1xf32>
    %60 = vector.broadcast %59 : vector<2x8x1xf32> to vector<2x8x8xf32>
    %61 = arith.subf %57, %60 : vector<2x8x8xf32>
    %62 = math.exp %61 : vector<2x8x8xf32>
    %cst_21 = arith.constant dense<0.000000e+00> : vector<2x8xf32>
    %63 = vector.multi_reduction <add>, %62, %cst_21 [2] : vector<2x8x8xf32> to vector<2x8xf32>
    %64 = vector.shape_cast %63 : vector<2x8xf32> to vector<2x8x1xf32>
    %65 = tpu.reciprocal %64 {approx = true} : vector<2x8x1xf32> -> vector<2x8x1xf32>
    %66 = vector.broadcast %65 : vector<2x8x1xf32> to vector<2x8x8xf32>
    %67 = arith.mulf %62, %66 : vector<2x8x8xf32>
    "tpu.trace_start"() <{level = 10 : i32, message = "bnm,bmd->bnd"}> : () -> ()
    %cst_22 = arith.constant dense<0.000000e+00> : vector<2x8x8xf32>
    %68 = tpu.matmul %67, %56, %cst_22 {dimension_numbers = #tpu.dot_dimension_numbers<[2], [1], [1], [2], [0, 0, 0, 1, 1, 2], [0], [0]>} : vector<2x8x8xf32>, vector<2x8x8xf32>, vector<2x8x8xf32> -> vector<2x8x8xf32>
    "tpu.trace_stop"() : () -> ()
    %69 = vector.shape_cast %68 : vector<2x8x8xf32> to vector<16x8xf32>
    %c8 = arith.constant 8 : index
    %c0_23 = arith.constant 0 : index
    %70 = vector.load %arg3[%c8, %c0_23] : memref<32x32xf32, #tpu.memory_space<vmem>>, vector<8x32xf32>
    %cst_24 = arith.constant dense<0.000000e+00> : vector<16x32xf32>
    %71 = tpu.matmul %69, %70, %cst_24 {dimension_numbers = #tpu.dot_dimension_numbers<[1], [0], [0], [1], [0, 0, 1, 1], [], []>} : vector<16x8xf32>, vector<8x32xf32>, vector<16x32xf32> -> vector<16x32xf32>
    %72 = arith.addf %50, %71 : vector<16x32xf32>
    %73 = vector.extract_strided_slice %24 {offsets = [0, 16], sizes = [16, 8], strides = [1, 1]} : vector<16x96xf32> to vector<16x8xf32>
    %74 = vector.shape_cast %73 : vector<16x8xf32> to vector<2x8x8xf32>
    %75 = vector.extract_strided_slice %24 {offsets = [0, 48], sizes = [16, 8], strides = [1, 1]} : vector<16x96xf32> to vector<16x8xf32>
    %76 = vector.shape_cast %75 : vector<16x8xf32> to vector<2x8x8xf32>
    %77 = vector.extract_strided_slice %24 {offsets = [0, 80], sizes = [16, 8], strides = [1, 1]} : vector<16x96xf32> to vector<16x8xf32>
    %78 = vector.shape_cast %77 : vector<16x8xf32> to vector<2x8x8xf32>
    "tpu.trace_start"() <{level = 10 : i32, message = "bnd,bmd->bnm"}> : () -> ()
    %cst_25 = arith.constant dense<0.000000e+00> : vector<2x8x8xf32>
    %79 = tpu.matmul %74, %76, %cst_25 {dimension_numbers = #tpu.dot_dimension_numbers<[2], [2], [1], [1], [0, 0, 0, 1, 1, 1], [0], [0]>} : vector<2x8x8xf32>, vector<2x8x8xf32>, vector<2x8x8xf32> -> vector<2x8x8xf32>
    "tpu.trace_stop"() : () -> ()
    %cst_26 = arith.constant dense<0xFF800000> : vector<2x8xf32>
    %80 = vector.multi_reduction <maximumf>, %79, %cst_26 [2] : vector<2x8x8xf32> to vector<2x8xf32>
    %81 = vector.shape_cast %80 : vector<2x8xf32> to vector<2x8x1xf32>
    %82 = vector.broadcast %81 : vector<2x8x1xf32> to vector<2x8x8xf32>
    %83 = arith.subf %79, %82 : vector<2x8x8xf32>
    %84 = math.exp %83 : vector<2x8x8xf32>
    %cst_27 = arith.constant dense<0.000000e+00> : vector<2x8xf32>
    %85 = vector.multi_reduction <add>, %84, %cst_27 [2] : vector<2x8x8xf32> to vector<2x8xf32>
    %86 = vector.shape_cast %85 : vector<2x8xf32> to vector<2x8x1xf32>
    %87 = tpu.reciprocal %86 {approx = true} : vector<2x8x1xf32> -> vector<2x8x1xf32>
    %88 = vector.broadcast %87 : vector<2x8x1xf32> to vector<2x8x8xf32>
    %89 = arith.mulf %84, %88 : vector<2x8x8xf32>
    "tpu.trace_start"() <{level = 10 : i32, message = "bnm,bmd->bnd"}> : () -> ()
    %cst_28 = arith.constant dense<0.000000e+00> : vector<2x8x8xf32>
    %90 = tpu.matmul %89, %78, %cst_28 {dimension_numbers = #tpu.dot_dimension_numbers<[2], [1], [1], [2], [0, 0, 0, 1, 1, 2], [0], [0]>} : vector<2x8x8xf32>, vector<2x8x8xf32>, vector<2x8x8xf32> -> vector<2x8x8xf32>
    "tpu.trace_stop"() : () -> ()
    %91 = vector.shape_cast %90 : vector<2x8x8xf32> to vector<16x8xf32>
    %c16 = arith.constant 16 : index
    %c0_29 = arith.constant 0 : index
    %92 = vector.load %arg3[%c16, %c0_29] : memref<32x32xf32, #tpu.memory_space<vmem>>, vector<8x32xf32>
    %cst_30 = arith.constant dense<0.000000e+00> : vector<16x32xf32>
    %93 = tpu.matmul %91, %92, %cst_30 {dimension_numbers = #tpu.dot_dimension_numbers<[1], [0], [0], [1], [0, 0, 1, 1], [], []>} : vector<16x8xf32>, vector<8x32xf32>, vector<16x32xf32> -> vector<16x32xf32>
    %94 = arith.addf %72, %93 : vector<16x32xf32>
    %95 = vector.extract_strided_slice %24 {offsets = [0, 24], sizes = [16, 8], strides = [1, 1]} : vector<16x96xf32> to vector<16x8xf32>
    %96 = vector.shape_cast %95 : vector<16x8xf32> to vector<2x8x8xf32>
    %97 = vector.extract_strided_slice %24 {offsets = [0, 56], sizes = [16, 8], strides = [1, 1]} : vector<16x96xf32> to vector<16x8xf32>
    %98 = vector.shape_cast %97 : vector<16x8xf32> to vector<2x8x8xf32>
    %99 = vector.extract_strided_slice %24 {offsets = [0, 88], sizes = [16, 8], strides = [1, 1]} : vector<16x96xf32> to vector<16x8xf32>
    %100 = vector.shape_cast %99 : vector<16x8xf32> to vector<2x8x8xf32>
    "tpu.trace_start"() <{level = 10 : i32, message = "bnd,bmd->bnm"}> : () -> ()
    %cst_31 = arith.constant dense<0.000000e+00> : vector<2x8x8xf32>
    %101 = tpu.matmul %96, %98, %cst_31 {dimension_numbers = #tpu.dot_dimension_numbers<[2], [2], [1], [1], [0, 0, 0, 1, 1, 1], [0], [0]>} : vector<2x8x8xf32>, vector<2x8x8xf32>, vector<2x8x8xf32> -> vector<2x8x8xf32>
    "tpu.trace_stop"() : () -> ()
    %cst_32 = arith.constant dense<0xFF800000> : vector<2x8xf32>
    %102 = vector.multi_reduction <maximumf>, %101, %cst_32 [2] : vector<2x8x8xf32> to vector<2x8xf32>
    %103 = vector.shape_cast %102 : vector<2x8xf32> to vector<2x8x1xf32>
    %104 = vector.broadcast %103 : vector<2x8x1xf32> to vector<2x8x8xf32>
    %105 = arith.subf %101, %104 : vector<2x8x8xf32>
    %106 = math.exp %105 : vector<2x8x8xf32>
    %cst_33 = arith.constant dense<0.000000e+00> : vector<2x8xf32>
    %107 = vector.multi_reduction <add>, %106, %cst_33 [2] : vector<2x8x8xf32> to vector<2x8xf32>
    %108 = vector.shape_cast %107 : vector<2x8xf32> to vector<2x8x1xf32>
    %109 = tpu.reciprocal %108 {approx = true} : vector<2x8x1xf32> -> vector<2x8x1xf32>
    %110 = vector.broadcast %109 : vector<2x8x1xf32> to vector<2x8x8xf32>
    %111 = arith.mulf %106, %110 : vector<2x8x8xf32>
    "tpu.trace_start"() <{level = 10 : i32, message = "bnm,bmd->bnd"}> : () -> ()
    %cst_34 = arith.constant dense<0.000000e+00> : vector<2x8x8xf32>
    %112 = tpu.matmul %111, %100, %cst_34 {dimension_numbers = #tpu.dot_dimension_numbers<[2], [1], [1], [2], [0, 0, 0, 1, 1, 2], [0], [0]>} : vector<2x8x8xf32>, vector<2x8x8xf32>, vector<2x8x8xf32> -> vector<2x8x8xf32>
    "tpu.trace_stop"() : () -> ()
    %113 = vector.shape_cast %112 : vector<2x8x8xf32> to vector<16x8xf32>
    %c24 = arith.constant 24 : index
    %c0_35 = arith.constant 0 : index
    %114 = vector.load %arg3[%c24, %c0_35] : memref<32x32xf32, #tpu.memory_space<vmem>>, vector<8x32xf32>
    %cst_36 = arith.constant dense<0.000000e+00> : vector<16x32xf32>
    %115 = tpu.matmul %113, %114, %cst_36 {dimension_numbers = #tpu.dot_dimension_numbers<[1], [0], [0], [1], [0, 0, 1, 1], [], []>} : vector<16x8xf32>, vector<8x32xf32>, vector<16x32xf32> -> vector<16x32xf32>
    %116 = arith.addf %94, %115 : vector<16x32xf32>
    %117 = vector.shape_cast %116 : vector<16x32xf32> to vector<2x8x32xf32>
    %c0_37 = arith.constant 0 : index
    %c0_38 = arith.constant 0 : index
    %c0_39 = arith.constant 0 : index
    %118 = vector.load %arg5[%c0_37, %c0_38, %c0_39] : memref<2x8x32xf32, #tpu.memory_space<vmem>>, vector<2x8x32xf32>
    tpu.vector_store %arg5[%c0_37, %c0_38, %c0_39], %117 {strides = array<i32>} : memref<2x8x32xf32, #tpu.memory_space<vmem>>, vector<2x8x32xf32>,
    return
  }
  func.func @transform_0(%arg0: i32) -> (i32, i32, i32) {
    %c0_i32 = arith.constant 0 : i32
    %c0_i32_0 = arith.constant 0 : i32
    %c0_i32_1 = arith.constant 0 : i32
    %c0_i32_2 = arith.constant 0 : i32
    return %c0_i32, %c0_i32_0, %c0_i32_1 : i32, i32, i32
  }
  func.func @transform_1(%arg0: i32) -> (i32, i32) {
    %c0_i32 = arith.constant 0 : i32
    %c0_i32_0 = arith.constant 0 : i32
    %c0_i32_1 = arith.constant 0 : i32
    return %c0_i32, %c0_i32_0 : i32, i32
  }
  func.func @transform_2(%arg0: i32) -> (i32, i32) {
    %c0_i32 = arith.constant 0 : i32
    %c0_i32_0 = arith.constant 0 : i32
    %c0_i32_1 = arith.constant 0 : i32
    return %c0_i32, %c0_i32_0 : i32, i32
  }
  func.func @transform_3(%arg0: i32) -> (i32, i32) {
    %c0_i32 = arith.constant 0 : i32
    %c0_i32_0 = arith.constant 0 : i32
    %c0_i32_1 = arith.constant 0 : i32
    return %c0_i32, %c0_i32_0 : i32, i32
  }
  func.func @transform_4(%arg0: i32) -> (i32, i32, i32) {
    %c0_i32 = arith.constant 0 : i32
    %c0_i32_0 = arith.constant 0 : i32
    %c0_i32_1 = arith.constant 0 : i32
    %c0_i32_2 = arith.constant 0 : i32
    return %c0_i32, %c0_i32_0, %c0_i32_1 : i32, i32, i32
  }
}

</mosaic_0001>

<bundles_post_ra>
// kernel: tpu_custom_call.1
= control target key start
LH: loop header
LB: loop body
LE: loop exit
PB: predicated region body
PF: predicated region fallthrough
CT: control target
= control target key end

     0   :  { %9 = vsyncpa [#allocation3], 0  ;;  %s1203_s0 = inlined_call_operand.hbm [shape: f32[2,8,32], index: 0, kind: input, shape index: {}]   ;;  %s1204_s1 = inlined_call_operand.hbm [shape: f32[32,96], index: 1, kind: input, shape index: {}]   ;;  %s1205_s2 = inlined_call_operand.hbm [shape: f32[32,32], index: 2, kind: input, shape index: {}]   ;;  %s1206_s3 = inlined_call_operand.vmem [shape: f32[2,96], index: 3, kind: input, shape index: {}]   ;;  %s1207_s4 = inlined_call_operand.hbm [shape: f32[2,8,32], index: 4, kind: output, shape index: {}]  }
   0x1   :  { %10 = vsyncpa [#allocation6], 0 }
   0x2   :  { %11 = vsyncpa [#allocation4], 0  ;;  %s29_s17 = sshll.u32 %s1204_s1, 4  ;;  %s1024_s18 = smov [#allocation5]   ;;  %s30_s17 = int_to_ptr.hbm [resolvable:$true] %s29_s17 }
   0x3   :  { %s31_s19 = sshll.u32 %s1024_s18, 4  ;;  %s16_s22 = sshll.u32 %s1203_s0, 4  ;;  %s32_s19 = int_to_ptr.vmem [resolvable:$true] %s31_s19  ;;  %s17_s22 = int_to_ptr.hbm [resolvable:$true] %s16_s22 }
   0x4   :  { %s1025_s23 = smov 128   ;;  %s1026_s24 = smov 8  }
   0x5   :  { %37 = dma.hbm_to_vmem [thread:$0]  %s30_s17, 512, %s32_s19, [#allocation6], %s1025_s23, %s1025_s23, %s1026_s24  }
   0x6   :  { %s1027_s25 = smov [#allocation2]   ;;  %s42_s1 = sshll.u32 %s1205_s2, 4  ;;  %s43_s1 = int_to_ptr.hbm [resolvable:$true] %s42_s1 }
   0x7   :  { %s18_s26 = sshll.u32 %s1027_s25, 4  ;;  %s1028_s0 = smov [#allocation7]   ;;  %s19_s26 = int_to_ptr.vmem [resolvable:$true] %s18_s26 }
   0x8   :  { %24 = dma.hbm_to_vmem [thread:$0]  %s17_s22, 256, %s19_s26, [#allocation3], %s1025_s23, %s1025_s23, %s1026_s24  }
   0x9   :  { %s44_s29 = sshll.u32 %s1028_s0, 4  ;;  %s45_s29 = int_to_ptr.vmem [resolvable:$true] %s44_s29 }
   0xa   :  { %50 = dma.hbm_to_vmem [thread:$0]  %s43_s1, 512, %s45_s29, [#allocation6], %s1025_s23, %s1025_s23, %s1026_s24  }
   0xb   :  { %1018 = dma.done.wait [#allocation3], 256  }
   0xc   :  { %1019 = vsyncadd [#allocation3], 4294967040 }
   0xd   :  { %1020 = dma.done.wait [#allocation6], 1024  }
   0xe   :  { %1021 = vsyncadd [#allocation6], 4294966272  ;;  %vm67_vm0 = vcmask 261120   ;;  %v65_v0 = vld [vmem:[#allocation2] sm:$0xff]  ;;  %v66_v2 = vld [vmem:[#allocation2 + $0x8] sm:$0xff]  ;;  %v1029_v4 = vmov 32.0  }
   0xf   :  { %v68_v1 = vsel %vm67_vm0, %v65_v0, 0.0  ;;  %v71_v3 = vsel %vm67_vm0, %v66_v2, 0.0  ;;  %884 = vrcp.f32 %v1029_v4  ;;  %v122_v21 = vld [vmem:[#allocation5 + $0x18] sm:$0xff]  ;;  %v121_v22 = vld [vmem:[#allocation5 + $0x10] sm:$0xff]  ;;  %v120_v23 = vld [vmem:[#allocation5 + $0x8] sm:$0xff]  ;;  %s1030_s5 = smov 96  }
  0x10   :  { %69 = vadd.xlane.f32.xlu0 %v68_v1  ;;  %143 = vmatpush.msra.mxu0 %v122_v21  ;;  %v119_v24 = vld [vmem:[#allocation5] sm:$0xff]  ;;  %v882_v48 = vld [vmem:[%s1206_s3] ss:$0 sm:$0xff]  ;;  %vm159_vm8 = vcmask 64512   ;;  %s1031_s6 = smov 120   ;;  %s1032_s7 = smov 88  }
  0x11   :  { %s1033_s8 = smov 64   ;;  %s1034_s9 = smov 80  }
  0x12   :  { %144 = vmatpush.msra.mxu0 %v121_v22  ;;  %s1035_s10 = smov 112   ;;  %s1036_s11 = smov 56  }
  0x13   :  { %s1037_s12 = smov 72   ;;  %s1038_s13 = smov 104  }
  0x14   :  { %145 = vmatpush.msra.mxu0 %v120_v23  ;;  %s1039_s14 = smov 48   ;;  %s1041_s17 = smov [#allocation8]  }
  0x15   :  { %v885_v5 = vpop.eup %884  ;;  %s809_s18 = sshll.u32 %s1041_s17, 4  ;;  %s811_s21 = sshll.u32 %s1207_s4, 4  ;;  %s810_s18 = int_to_ptr.vmem [resolvable:$true] %s809_s18  ;;  %s812_s21 = int_to_ptr.hbm [resolvable:$true] %s811_s21 }
  0x16   :  { %v75_v6 = vmul.f32 32.0, %v885_v5  ;;  %vm79_vm1 = vweird.f32 %v885_v5  ;;  %146 = vmatpush.msra.mxu0 %v119_v24 }
  0x18   :  { %72 = vadd.xlane.f32.xlu0 %v71_v3  ;;  %v76_v7 = vsub.f32 1.0, %v75_v6 }
  0x1a   :  { %v77_v8 = vmul.f32 %v885_v5, %v76_v7 }
  0x1c   :  { %v78_v9 = vadd.f32 %v885_v5, %v77_v8 }
  0x1e   :  { %v80_v10 = vsel %vm79_vm1, %v885_v5, %v78_v9 }
  0x83   :  { %v70_v11 = vpop.xlane.xlu0 %69 }
  0x84   :  { %v81_v12 = vmul.f32 %v80_v10, %v70_v11 }
  0x86   :  { %v83_v13 = vsub.f32 %v65_v0, %v81_v12 }
  0x88   :  { %v85_v14 = vmul.f32 %v83_v13, %v83_v13 }
  0x8a   :  { %v87_v15 = vsel %vm67_vm0, %v85_v14, 0.0 }
  0x8b   :  { %88 = vadd.xlane.f32.xlu1 %v87_v15  ;;  %v73_v16 = vpop.xlane.xlu0 %72 }
  0x8c   :  { %v82_v17 = vmul.f32 %v80_v10, %v73_v16 }
  0x8e   :  { %v84_v18 = vsub.f32 %v66_v2, %v82_v17 }
  0x90   :  { %v86_v19 = vmul.f32 %v84_v18, %v84_v18 }
  0x92   :  { %v90_v20 = vsel %vm67_vm0, %v86_v19, 0.0 }
  0x93   :  { %91 = vadd.xlane.f32.xlu1 %v90_v20 }
  0xfe   :  { %v89_v25 = vpop.xlane.xlu1 %88 }
  0xff   :  { %v93_v26 = vmul.f32 %v89_v25, %v80_v10 }
 0x101   :  { %v95_v27 = vadd.f32 1e-05, %v93_v26 }
 0x103   :  { %886 = vrsqrt.f32 %v95_v27  ;;  %vm103_vm3 = vweird.f32 %v95_v27 }
 0x106   :  { %v92_v28 = vpop.xlane.xlu1 %91 }
 0x107   :  { %v94_v29 = vmul.f32 %v92_v28, %v80_v10  ;;  %v285_v10 = vld [vmem:[#allocation7] sm:$0xff] }
 0x109   :  { %v887_v30 = vpop.eup %886  ;;  %v96_v31 = vadd.f32 1e-05, %v94_v29 }
 0x10a   :  { %v98_v32 = vmul.f32 %v887_v30, %v95_v27  ;;  %vm104_vm2 = vweird.f32 %v887_v30 }
 0x10b   :  { %888 = vrsqrt.f32 %v96_v31  ;;  %vm105_vm4 = vmor %vm103_vm3, %vm104_vm2  ;;  %vm113_vm6 = vweird.f32 %v96_v31 }
 0x10c   :  { %v99_v33 = vmul.f32 %v887_v30, %v98_v32 }
 0x10e   :  { %v100_v34 = vmul.f32 0.5, %v99_v33 }
 0x110   :  { %v101_v35 = vsub.f32 1.5, %v100_v34 }
 0x111   :  { %v889_v36 = vpop.eup %888 }
 0x112   :  { %v108_v37 = vmul.f32 %v889_v36, %v96_v31  ;;  %v102_v38 = vmul.f32 %v887_v30, %v101_v35  ;;  %vm114_vm5 = vweird.f32 %v889_v36 }
 0x113   :  { %vm115_vm7 = vmor %vm113_vm6, %vm114_vm5 }
 0x114   :  { %v109_v39 = vmul.f32 %v889_v36, %v108_v37  ;;  %v106_v40 = vsel %vm105_vm4, %v887_v30, %v102_v38 }
 0x115   :  { %v117_v41 = vmul.f32 %v106_v40, %v83_v13 }
 0x116   :  { %v110_v42 = vmul.f32 0.5, %v109_v39 }
 0x117   :  { %825 = vmatmul.msk.f32.vlgmr.msra.gmra.mxu0 %vm67_vm0, %v117_v41 }
 0x118   :  { %v111_v43 = vsub.f32 1.5, %v110_v42 }
 0x11a   :  { %v112_v44 = vmul.f32 %v889_v36, %v111_v43 }
 0x11c   :  { %v116_v45 = vsel %vm115_vm7, %v889_v36, %v112_v44 }
 0x11d   :  { %v118_v46 = vmul.f32 %v116_v45, %v84_v18 }
 0x11f   :  { %826 = vmatmul.msk.f32.gmra.mxu0 %vm67_vm0, %v118_v46  ;;  %v447_v46 = vld [vmem:[#allocation7 + $0x8] sm:$0xff] }
 0x194   :  { %v148_v47 = vpop.f32.mrf.mxu0 }
 0x195   :  { %v1097_v51 = vadd.f32 %v882_v48, %v148_v47 }
 0x19c   :  { %v151_v49 = vpop.f32.mrf.mxu0 }
 0x19d   :  { %v1094_v50 = vadd.f32 %v882_v48, %v151_v49 }
 0x19f   :  { %185 = vrot.lane.b32.xlu2 %v1094_v50, %s1030_s5  ;;  %v877_v58 = vpack.i.bf16 %v1094_v50, %v1097_v51 }
 0x1a7   :  { %157 = vrot.lane.b32.xlu2 %v1097_v51, %s1030_s5 }
 0x1f9   :  { %v186_v52 = vpop.permute.xlu2 %185 }
 0x1fa   :  { %829 = vmatpush.xpose.msk.msra.mxu2 %vm159_vm8, %v186_v52 }
 0x1fd   :  { %830 = vmatmul.msk.f32.vlgmr.msra.gmra.mxu2 %vm159_vm8, %v1094_v50 }
 0x201   :  { %v158_v53 = vpop.permute.xlu2 %157 }
 0x202   :  { %827 = vmatpush.xpose.msk.msra.mxu1 %vm159_vm8, %v158_v53 }
 0x205   :  { %828 = vmatmul.msk.f32.vlgmr.msra.gmra.mxu1 %vm159_vm8, %v1097_v51 }
 0x280   :  { %v208_v54 = vpop.f32.mrf.mxu2 }
 0x281   :  { %v214_v55 = vsel %vm159_vm8, %v208_v54, -inf }
 0x282   :  { %215 = vmax.xlane.f32.xlu1 %v214_v55  ;;  %v181_v56 = vpop.f32.mrf.mxu1 }
 0x283   :  { %v211_v57 = vsel %vm159_vm8, %v181_v56, -inf }
 0x284   :  { %212 = vmax.xlane.f32.xlu0 %v211_v57 }
 0x298   :  { %317 = vrot.lane.b32.xlu0 %v1097_v51, %s1031_s6 }
 0x29b   :  { %319 = vrot.lane.b32.xlu1 %v1097_v51, %s1032_s7 }
 0x2a3   :  { %878 = vrot.lane.b32.xlu1 %v877_v58, %s1033_s8 }
 0x2ab   :  { %345 = vrot.lane.b32.xlu1 %v1094_v50, %s1031_s6 }
 0x2f5   :  { %v216_v59 = vpop.xlane.xlu1 %215 }
 0x2f6   :  { %v218_v60 = vsub.f32 %v208_v54, %v216_v59 }
 0x2f7   :  { %v213_v61 = vpop.xlane.xlu0 %212 }
 0x2f8   :  { %v221_v62 = vmul.f32 1.442695, %v218_v60  ;;  %v217_v63 = vsub.f32 %v181_v56, %v213_v61 }
 0x2fa   :  { %890 = vpow2.f32 %v221_v62  ;;  %v219_v0 = vmul.f32 1.442695, %v217_v63 }
 0x2fc   :  { %892 = vpow2.f32 %v219_v0 }
 0x300   :  { %v891_v1 = vpop.eup %890 }
 0x301   :  { %v226_v2 = vsel %vm159_vm8, %v891_v1, 0.0 }
 0x302   :  { %v893_v3 = vpop.eup %892  ;;  %227 = vadd.xlane.f32.xlu0 %v226_v2 }
 0x303   :  { %v223_v4 = vsel %vm159_vm8, %v893_v3, 0.0 }
 0x304   :  { %224 = vadd.xlane.f32.xlu2 %v223_v4 }
 0x30a   :  { %v318_v6 = vpop.permute.xlu0 %317 }
 0x30d   :  { %v320_v5 = vpop.permute.xlu1 %319 }
 0x30e   :  { %835 = vmatpush.xpose.msk.msrb.mxu2 %vm159_vm8, %v320_v5 }
 0x311   :  { %836 = vmatmul.msk.f32.vlgmr.msrb.gmra.mxu2 %vm159_vm8, %v318_v6 }
 0x315   :  { %v879_v7 = vpop.permute.xlu1 %878 }
 0x316   :  { %347 = vrot.lane.b32.xlu0 %v1094_v50, %s1032_s7  ;;  %v880_v8 = vunpack.i.l.bf16 %v879_v7  ;;  %v881_v9 = vunpack.i.h.bf16 %v879_v7  ;;  %v609_v7 = vld [vmem:[#allocation7 + $0x10] sm:$0xff] }
 0x318   :  { %254 = vmatpush.msrb.mxu1 %v880_v8  ;;  %280 = vmatpush.msra.mxu3 %v881_v9 }
 0x31a   :  { %307 = vmatpush.msra.mxu1 %v285_v10 }
 0x31c   :  { %481 = vrot.lane.b32.xlu2 %v1097_v51, %s1034_s9 }
 0x31d   :  { %v346_v19 = vpop.permute.xlu1 %345 }
 0x31e   :  { %479 = vrot.lane.b32.xlu0 %v1097_v51, %s1035_s10 }
 0x375   :  { %v228_v11 = vpop.xlane.xlu0 %227 }
 0x376   :  { %894 = vrcp.f32 %v228_v11 }
 0x377   :  { %v225_v12 = vpop.xlane.xlu2 %224 }
 0x378   :  { %896 = vrcp.f32 %v225_v12  ;;  %v883_v12 = vld [vmem:[%s1206_s3 + $0x1] ss:$0 sm:$0xff]  ;;  %s1040_s3 = smov 40  }
 0x37c   :  { %v895_v13 = vpop.eup %894 }
 0x37d   :  { %v232_v14 = vmul.f32 %v895_v13, %v891_v1 }
 0x37e   :  { %v897_v15 = vpop.eup %896 }
 0x37f   :  { %v482_v16 = vpop.permute.xlu2 %481  ;;  %832 = vmatmul.msk.f32.vlgmr.msra.gmra.mxu3 %vm159_vm8, %v232_v14  ;;  %v231_v17 = vmul.f32 %v897_v15, %v893_v3 }
 0x381   :  { %831 = vmatmul.msk.f32.vlgmr.msrb.gmra.mxu1 %vm159_vm8, %v231_v17 }
 0x382   :  { %843 = vmatpush.xpose.msk.msrb.mxu1 %vm159_vm8, %v482_v16 }
 0x388   :  { %v348_v18 = vpop.permute.xlu0 %347 }
 0x389   :  { %837 = vmatpush.xpose.msk.msrb.mxu3 %vm159_vm8, %v348_v18 }
 0x38c   :  { %838 = vmatmul.msk.f32.vlgmr.msrb.gmra.mxu3 %vm159_vm8, %v346_v19 }
 0x38d   :  { %469 = vmatpush.msra.mxu3 %v447_v46 }
 0x390   :  { %v480_v27 = vpop.permute.xlu0 %479 }
 0x394   :  { %v342_v20 = vpop.f32.mrf.mxu2 }
 0x395   :  { %v373_v21 = vsel %vm159_vm8, %v342_v20, -inf }
 0x396   :  { %374 = vmax.xlane.f32.xlu1 %v373_v21 }
 0x3af   :  { %395 = vrot.lane.b32.xlu1 %v1097_v51, %s1036_s11 }
 0x3b7   :  { %509 = vrot.lane.b32.xlu1 %v1094_v50, %s1034_s9 }
 0x3bf   :  { %643 = vrot.lane.b32.xlu1 %v1097_v51, %s1037_s12 }
 0x3c7   :  { %641 = vrot.lane.b32.xlu1 %v1097_v51, %s1038_s13 }
 0x3fe   :  { %v256_v22 = vpop.f32.mrf.mxu1 }
 0x3ff   :  { %833 = vmatmul.msk.f32.vlgmr.msra.gmra.mxu1 %vm159_vm8, %v256_v22 }
 0x402   :  { %v282_v23 = vpop.f32.mrf.mxu3 }
 0x407   :  { %834 = vmatmul.msk.f32.gmra.mxu1 %vm159_vm8, %v282_v23 }
 0x409   :  { %v375_v24 = vpop.xlane.xlu1 %374 }
 0x40a   :  { %v379_v25 = vsub.f32 %v342_v20, %v375_v24 }
 0x40c   :  { %v381_v26 = vmul.f32 1.442695, %v379_v25 }
 0x40e   :  { %898 = vpow2.f32 %v381_v26 }
 0x40f   :  { %v370_v28 = vpop.f32.mrf.mxu3  ;;  %844 = vmatmul.msk.f32.vlgmr.msrb.gmra.mxu1 %vm159_vm8, %v480_v27 }
 0x410   :  { %v376_v29 = vsel %vm159_vm8, %v370_v28, -inf }
 0x411   :  { %377 = vmax.xlane.f32.xlu0 %v376_v29 }
 0x414   :  { %v899_v30 = vpop.eup %898 }
 0x415   :  { %v385_v31 = vsel %vm159_vm8, %v899_v30, 0.0 }
 0x416   :  { %386 = vadd.xlane.f32.xlu2 %v385_v31 }
 0x421   :  { %v396_v32 = vpop.permute.xlu1 %395 }
 0x422   :  { %416 = vmatpush.msra.mxu2 %v396_v32 }
 0x429   :  { %v510_v33 = vpop.permute.xlu1 %509 }
 0x42a   :  { %845 = vmatpush.xpose.msk.msrb.mxu2 %vm159_vm8, %v510_v33 }
 0x431   :  { %v644_v63 = vpop.permute.xlu1 %643 }
 0x439   :  { %v642_v2 = vpop.permute.xlu1 %641 }
 0x47c   :  { %v1140_v34 = vpop.f32.mrf.mxu1 }
 0x484   :  { %v1142_v35 = vpop.f32.mrf.mxu1  ;;  %v378_v36 = vpop.xlane.xlu0 %377 }
 0x485   :  { %v380_v37 = vsub.f32 %v370_v28, %v378_v36  ;;  %v316_v14 = vadd.f32 %v883_v12, %v1142_v35 }
 0x487   :  { %v383_v38 = vmul.f32 1.442695, %v380_v37 }
 0x489   :  { %900 = vpow2.f32 %v383_v38  ;;  %v387_v39 = vpop.xlane.xlu2 %386 }
 0x48a   :  { %902 = vrcp.f32 %v387_v39 }
 0x48c   :  { %v504_v40 = vpop.f32.mrf.mxu1 }
 0x48d   :  { %v535_v41 = vsel %vm159_vm8, %v504_v40, -inf }
 0x48e   :  { %536 = vmax.xlane.f32.xlu2 %v535_v41 }
 0x48f   :  { %v901_v42 = vpop.eup %900 }
 0x490   :  { %v903_v43 = vpop.eup %902  ;;  %v388_v44 = vsel %vm159_vm8, %v901_v42, 0.0 }
 0x491   :  { %v393_v45 = vmul.f32 %v903_v43, %v899_v30  ;;  %389 = vadd.xlane.f32.xlu0 %v388_v44 }
 0x493   :  { %839 = vmatmul.msk.f32.vlgmr.msra.gmra.mxu2 %vm159_vm8, %v393_v45 }
 0x494   :  { %631 = vmatpush.msra.mxu2 %v609_v7 }
 0x4a5   :  { %421 = vrot.lane.b32.xlu0 %v1094_v50, %s1036_s11 }
 0x4ad   :  { %507 = vrot.lane.b32.xlu0 %v1094_v50, %s1035_s10 }
 0x4b5   :  { %671 = vrot.lane.b32.xlu0 %v1094_v50, %s1037_s12 }
 0x4bd   :  { %669 = vrot.lane.b32.xlu0 %v1094_v50, %s1038_s13 }
 0x501   :  { %v537_v47 = vpop.xlane.xlu2 %536 }
 0x502   :  { %v541_v48 = vsub.f32 %v504_v40, %v537_v47 }
 0x504   :  { %v543_v49 = vmul.f32 1.442695, %v541_v48  ;;  %v390_v52 = vpop.xlane.xlu0 %389  ;;  %v315_v48 = vadd.f32 %v883_v12, %v1140_v34 }
 0x506   :  { %904 = vpow2.f32 %v543_v49 }
 0x507   :  { %906 = vrcp.f32 %v390_v52 }
 0x50c   :  { %v905_v53 = vpop.eup %904 }
 0x50d   :  { %v547_v54 = vsel %vm159_vm8, %v905_v53, 0.0  ;;  %v907_v55 = vpop.eup %906 }
 0x50e   :  { %548 = vadd.xlane.f32.xlu2 %v547_v54  ;;  %v394_v58 = vmul.f32 %v907_v55, %v901_v42 }
 0x516   :  { %v418_v56 = vpop.f32.mrf.mxu2 }
 0x517   :  { %841 = vmatmul.msk.f32.vlgmr.msra.gmra.mxu3 %vm159_vm8, %v418_v56  ;;  %v422_v57 = vpop.permute.xlu0 %421 }
 0x518   :  { %442 = vmatpush.msrb.mxu0 %v422_v57 }
 0x519   :  { %840 = vmatmul.msk.f32.vlgmr.msrb.gmra.mxu0 %vm159_vm8, %v394_v58 }
 0x51f   :  { %v508_v59 = vpop.permute.xlu0 %507 }
 0x520   :  { %846 = vmatmul.msk.f32.vlgmr.msrb.gmra.mxu2 %vm159_vm8, %v508_v59 }
 0x526   :  { %557 = vrot.lane.b32.xlu2 %v1097_v51, %s1039_s14 }
 0x527   :  { %v672_v60 = vpop.permute.xlu0 %671 }
 0x528   :  { %853 = vmatpush.xpose.msk.msrb.mxu3 %vm159_vm8, %v672_v60 }
 0x52f   :  { %v670_v4 = vpop.permute.xlu0 %669 }
 0x581   :  { %v549_v61 = vpop.xlane.xlu2 %548 }
 0x582   :  { %908 = vrcp.f32 %v549_v61 }
 0x588   :  { %v909_v62 = vpop.eup %908 }
 0x589   :  { %v555_v0 = vmul.f32 %v909_v62, %v905_v53  ;;  %v558_v1 = vpop.permute.xlu2 %557 }
 0x58a   :  { %578 = vmatpush.msra.mxu0 %v558_v1 }
 0x58b   :  { %847 = vmatmul.msk.f32.vlgmr.msra.gmra.mxu0 %vm159_vm8, %v555_v0 }
 0x58c   :  { %851 = vmatpush.xpose.msk.msrb.mxu0 %vm159_vm8, %v644_v63 }
 0x593   :  { %852 = vmatmul.msk.f32.vlgmr.msrb.gmra.mxu0 %vm159_vm8, %v642_v2 }
 0x596   :  { %v444_v3 = vpop.f32.mrf.mxu0 }
 0x597   :  { %842 = vmatmul.msk.f32.gmra.mxu3 %vm159_vm8, %v444_v3 }
 0x59a   :  { %v1170_v11 = vpop.f32.mrf.mxu3 }
 0x59b   :  { %v477_v52 = vadd.f32 %v1170_v11, %v315_v48 }
 0x59f   :  { %854 = vmatmul.msk.f32.vlgmr.msrb.gmra.mxu3 %vm159_vm8, %v670_v4 }
 0x5a3   :  { %v532_v5 = vpop.f32.mrf.mxu2 }
 0x5a4   :  { %v538_v6 = vsel %vm159_vm8, %v532_v5, -inf }
 0x5a5   :  { %539 = vmax.xlane.f32.xlu1 %v538_v6 }
 0x608   :  { %v580_v8 = vpop.f32.mrf.mxu0 }
 0x609   :  { %849 = vmatmul.msk.f32.vlgmr.msra.gmra.mxu2 %vm159_vm8, %v580_v8 }
 0x610   :  { %v666_v9 = vpop.f32.mrf.mxu0 }
 0x611   :  { %v697_v10 = vsel %vm159_vm8, %v666_v9, -inf }
 0x612   :  { %698 = vmax.xlane.f32.xlu0 %v697_v10 }
 0x618   :  { %v540_v13 = vpop.xlane.xlu1 %539 }
 0x619   :  { %v542_v15 = vsub.f32 %v532_v5, %v540_v13 }
 0x61a   :  { %v474_v16 = vpop.f32.mrf.mxu3 }
 0x61b   :  { %v545_v17 = vmul.f32 1.442695, %v542_v15  ;;  %v1176_v18 = vadd.f32 %v474_v16, %v316_v14 }
 0x61d   :  { %910 = vpow2.f32 %v545_v17 }
 0x622   :  { %v694_v19 = vpop.f32.mrf.mxu3 }
 0x623   :  { %v911_v20 = vpop.eup %910  ;;  %v700_v21 = vsel %vm159_vm8, %v694_v19, -inf }
 0x624   :  { %701 = vmax.xlane.f32.xlu2 %v700_v21  ;;  %v550_v22 = vsel %vm159_vm8, %v911_v20, 0.0 }
 0x625   :  { %551 = vadd.xlane.f32.xlu1 %v550_v22 }
 0x626   :  { %583 = vrot.lane.b32.xlu0 %v1094_v50, %s1039_s14 }
 0x685   :  { %v699_v23 = vpop.xlane.xlu0 %698 }
 0x686   :  { %v703_v24 = vsub.f32 %v666_v9, %v699_v23 }
 0x688   :  { %v705_v25 = vmul.f32 1.442695, %v703_v24 }
 0x68a   :  { %912 = vpow2.f32 %v705_v25 }
 0x68c   :  { %v633_v49 = vpop.f32.mrf.mxu2 }
 0x68d   :  { %v639_v53 = vadd.f32 %v633_v49, %v477_v52 }
 0x690   :  { %v913_v26 = vpop.eup %912 }
 0x691   :  { %v709_v27 = vsel %vm159_vm8, %v913_v26, 0.0 }
 0x692   :  { %710 = vadd.xlane.f32.xlu2 %v709_v27 }
 0x697   :  { %v702_v28 = vpop.xlane.xlu2 %701 }
 0x698   :  { %v704_v29 = vsub.f32 %v694_v19, %v702_v28  ;;  %v552_v30 = vpop.xlane.xlu1 %551  ;;  %v584_v31 = vpop.permute.xlu0 %583 }
 0x699   :  { %914 = vrcp.f32 %v552_v30  ;;  %604 = vmatpush.msra.mxu1 %v584_v31 }
 0x69a   :  { %v707_v32 = vmul.f32 1.442695, %v704_v29 }
 0x69c   :  { %916 = vpow2.f32 %v707_v32 }
 0x69f   :  { %v915_v33 = vpop.eup %914 }
 0x6a0   :  { %v556_v35 = vmul.f32 %v915_v33, %v911_v20 }
 0x6a2   :  { %v917_v36 = vpop.eup %916  ;;  %848 = vmatmul.msk.f32.vlgmr.msra.gmra.mxu1 %vm159_vm8, %v556_v35 }
 0x6a3   :  { %v712_v37 = vsel %vm159_vm8, %v917_v36, 0.0 }
 0x6a4   :  { %713 = vadd.xlane.f32.xlu1 %v712_v37 }
 0x6aa   :  { %719 = vrot.lane.b32.xlu2 %v1097_v51, %s1040_s3 }
 0x6bd   :  { %745 = vrot.lane.b32.xlu1 %v1094_v50, %s1040_s3  ;;  %v771_v50 = vld [vmem:[#allocation7 + $0x18] sm:$0xff] }
 0x6be   :  { %793 = vmatpush.msra.mxu3 %v771_v50 }
 0x705   :  { %v711_v38 = vpop.xlane.xlu2 %710 }
 0x706   :  { %918 = vrcp.f32 %v711_v38 }
 0x70c   :  { %v919_v39 = vpop.eup %918 }
 0x70d   :  { %v717_v40 = vmul.f32 %v919_v39, %v913_v26  ;;  %v720_v41 = vpop.permute.xlu2 %719 }
 0x70e   :  { %740 = vmatpush.msrb.mxu1 %v720_v41 }
 0x70f   :  { %855 = vmatmul.msk.f32.vlgmr.msrb.gmra.mxu1 %vm159_vm8, %v717_v40 }
 0x717   :  { %v714_v43 = vpop.xlane.xlu1 %713 }
 0x718   :  { %920 = vrcp.f32 %v714_v43 }
 0x71e   :  { %v921_v44 = vpop.eup %920 }
 0x71f   :  { %v606_v42 = vpop.f32.mrf.mxu1  ;;  %v718_v45 = vmul.f32 %v921_v44, %v917_v36 }
 0x720   :  { %850 = vmatmul.msk.f32.gmra.mxu2 %vm159_vm8, %v606_v42 }
 0x72f   :  { %v746_v46 = vpop.permute.xlu1 %745 }
 0x730   :  { %766 = vmatpush.msra.mxu0 %v746_v46 }
 0x731   :  { %856 = vmatmul.msk.f32.vlgmr.msra.gmra.mxu0 %vm159_vm8, %v718_v45 }
 0x78c   :  { %v742_v51 = vpop.f32.mrf.mxu1 }
 0x78d   :  { %857 = vmatmul.msk.f32.vlgmr.msra.gmra.mxu3 %vm159_vm8, %v742_v51 }
 0x7a3   :  { %v636_v56 = vpop.f32.mrf.mxu2 }
 0x7a4   :  { %v640_v57 = vadd.f32 %v636_v56, %v1176_v18 }
 0x7ae   :  { %v768_v47 = vpop.f32.mrf.mxu0 }
 0x7af   :  { %858 = vmatmul.msk.f32.gmra.mxu3 %vm159_vm8, %v768_v47 }
 0x810   :  { %v795_v54 = vpop.f32.mrf.mxu3 }
 0x811   :  { %v801_v55 = vadd.f32 %v795_v54, %v639_v53 }
 0x813   :  { %803 = vst.msk [vmem:[#allocation8] sm:$0xff] %vm67_vm0, %v801_v55 }
 0x832   :  { %v798_v58 = vpop.f32.mrf.mxu3 }
 0x833   :  { %v802_v59 = vadd.f32 %v798_v58, %v640_v57 }
 0x835   :  { %804 = vst.msk [vmem:[#allocation8 + $0x8] sm:$0xff] %vm67_vm0, %v802_v59 }
 0x836   :  { %817 = dma.vmem_to_hbm [thread:$0]  %s810_s18, 256, %s812_s21, [#allocation4], %s1025_s23, %s1025_s23, %s1026_s24  }
 0x837   :  { %1022 = dma.done.wait [#allocation4], 256  }
 0x838   :  { %1023 = vsyncadd [#allocation4], 4294967040 }
 0x839   :  { %822 = vsyncpa [#allocation3], 1 }
 0x83a   :  { %823 = vsyncpa [#allocation6], 1 }
 0x83b   :  { %824 = vsyncpa [#allocation4], 1 }

</bundles_post_ra>
